<compile_context>
chip_gen: v7x
topology: tpu7x:2x2x1
jax: 0.10.0
libtpu: 0.0.40
codegen_flags: <defaults>
</compile_context>

<pallas_src>
import functools
import math

import jax
import jax.numpy as jnp
from jax import lax
from jax.experimental import pallas as pl
from jax.experimental.pallas import tpu as pltpu


def _graph_learner_kernel(ctx_ref, w_ref, out_ref, *, epsilon, num_pers,
                          use_bf16_mxu):
    # ctx_ref : (Bt, N, D)    node features for Bt batch elements
    # w_ref   : (P, D)        perspective weights (resident across the grid)
    # out_ref : (Bt, 1, N*N)  lane-dense attention output slab
    ctx = ctx_ref[...]                                       # (Bt, N, D) f32
    w = w_ref[...]                                           # (P, D)     f32
    bt, n, d = ctx.shape
    p = num_pers

    # Weighted features in (Bt, N, P, D) layout -> trailing-dim reshape to
    # (Bt, N, P*D) is layout-free (P*D is a multiple of 128 at demo shapes).
    fc = ctx[:, :, None, :] * w[None, None, :, :]            # (Bt, N, P, D)

    # F.normalize(p=2, dim=-1): x / clamp_min(||x||_2, 1e-12)
    #   == x * rsqrt(clamp_min(||x||^2, 1e-24))   (rsqrt -> EUP slot)
    # The 1/P mean over perspectives is folded in as 1/sqrt(P) on each operand:
    #   (a/sqrt(P)) @ (a/sqrt(P))^T == (a @ a^T) / P
    sq = jnp.sum(fc * fc, axis=-1, keepdims=True)            # (Bt, N, P, 1)
    inv = lax.rsqrt(jnp.maximum(sq, jnp.float32(1e-24)))
    inv = inv * jnp.float32(1.0 / math.sqrt(p))
    a = (fc * inv).reshape(bt, n, p * d)                     # (Bt, N, P*D)

    if use_bf16_mxu:
        # Optional bf16 MXU operands (f32 accumulation) for v6e/v7x throughput.
        a = a.astype(jnp.bfloat16)

    # sum_p normed_p @ normed_p^T == A @ A^T with A = (N, P*D); single batched
    # MXU contraction, transpose expressed via contraction dims (no XLU xpose).
    att = jnp.einsum("bnk,bmk->bnm", a, a,
                     preferred_element_type=jnp.float32)     # (Bt, N, N)

    if epsilon is not None:
        # build_epsilon_neighbourhood with markoff_value = 0
        att = jnp.where(att > jnp.float32(epsilon), att, jnp.float32(0.0))

    # Lane-dense store: last dim N*N is a multiple of 128 at demo shapes.
    out_ref[...] = att.reshape(bt, 1, n * n).astype(out_ref.dtype)
    # TODO(synk): for large N, tile the (N, N) output over 128-multiple row/col
    # blocks with an explicit vmem_limit_bytes budget (v7x has only 64 MiB VMEM)
    # and add a second "parallel" grid axis over row tiles for its 2 TensorCores.


def _pick_batch_tile(batch, max_bt=8):
    """Largest divisor of `batch` <= max_bt that still keeps grid >= 2 steps
    (so megacore sharding has work), else the largest divisor <= max_bt."""
    divisors = [d for d in range(1, min(batch, max_bt) + 1) if batch % d == 0]
    for d in reversed(divisors):
        if batch // d >= 2:
            return d
    return divisors[-1]


def graph_learner_weighted_cosine(context, weight, epsilon=None,
                                  use_bf16_mxu=False):
    """context: (B, N, D) float32, weight: (P, D) float32 -> (B, N, N) float32."""
    B, N, D = context.shape
    P, Dw = weight.shape
    assert D == Dw

    bt = _pick_batch_tile(B)
    kernel = functools.partial(_graph_learner_kernel, epsilon=epsilon,
                               num_pers=P, use_bf16_mxu=use_bf16_mxu)

    out_flat = pl.pallas_call(
        kernel,
        out_shape=jax.ShapeDtypeStruct((B, 1, N * N), jnp.float32),
        grid_spec=pltpu.PrefetchScalarGridSpec(
            num_scalar_prefetch=0,
            grid=(B // bt,),
            in_specs=[
                pl.BlockSpec((bt, N, D), lambda b: (b, 0, 0)),
                # Constant block index -> weight is DMA'd once, stays resident.
                pl.BlockSpec((P, D), lambda b: (0, 0)),
            ],
            out_specs=pl.BlockSpec((bt, 1, N * N), lambda b: (b, 0, 0)),
        ),
        compiler_params=pltpu.CompilerParams(
            dimension_semantics=("parallel",),
        ),
    )(context, weight)
    return out_flat.reshape(B, N, N)


def _reference(context, weight, epsilon=None):
    # Pure-JAX reference mirroring the PyTorch forward.
    fc = context[None, :, :, :] * weight[:, None, None, :]             # (P, B, N, D)
    norm = jnp.sqrt(jnp.sum(fc * fc, axis=-1, keepdims=True))
    normed = fc / jnp.maximum(norm, 1e-12)
    att = jnp.einsum("pbnd,pbmd->pbnm", normed, normed).mean(axis=0)   # (B, N, N)
    if epsilon is not None:
        mask = (att > epsilon).astype(att.dtype)
        att = att * mask
    return att


def _xavier_uniform(key, shape):
    fan_out, fan_in = shape  # torch 2-D: fan_in = dim1, fan_out = dim0
    bound = jnp.sqrt(6.0 / (fan_in + fan_out))
    return jax.random.uniform(key, shape, jnp.float32, -bound, bound)


if __name__ == "__main__":
    B, N, D, P = 2, 16, 32, 4   # P*D = 128 -> lane-dense contraction dim
    epsilon = 0.3

    key = jax.random.PRNGKey(0)
    k_ctx, k_w = jax.random.split(key)
    context = jax.random.normal(k_ctx, (B, N, D), dtype=jnp.float32)
    weight = _xavier_uniform(k_w, (P, D))

    out = graph_learner_weighted_cosine(context, weight, epsilon=epsilon)
    out = jax.block_until_ready(out)

    ref = _reference(context, weight, epsilon=epsilon)
    assert out.shape == (B, N, N)
    assert jnp.allclose(out, ref, atol=1e-4, rtol=1e-4), "mismatch vs reference"

    print("KERNEL_OK")
</pallas_src>

<mosaic_0001>
module attributes {stable_mosaic.version = 11 : i64} {
  func.func @_graph_learner_kernel(%arg0: i32, %arg1: memref<1x16x32xf32, #tpu.memory_space<vmem>>, %arg2: memref<4x32xf32, #tpu.memory_space<vmem>>, %arg3: memref<1x1x256xf32, #tpu.memory_space<vmem>>) attributes {dimension_semantics = [#tpu.dimension_semantics<parallel>], iteration_bounds = array<i64: 2>, scalar_prefetch = 0 : i64, scratch_operands = 0 : i64, tpu.core_type = #tpu.core_type<tc>, window_params = [{transform_indices = @transform_0, window_bounds = array<i64: 1, 16, 32>}, {pipeline_mode = #tpu.pipeline_mode<synchronous>, transform_indices = @transform_1, window_bounds = array<i64: 4, 32>}, {transform_indices = @transform_2, window_bounds = array<i64: 1, 1, 256>}]} {
    %c0 = arith.constant 0 : index
    %c0_0 = arith.constant 0 : index
    %c0_1 = arith.constant 0 : index
    %0 = vector.load %arg1[%c0, %c0_0, %c0_1] : memref<1x16x32xf32, #tpu.memory_space<vmem>>, vector<1x16x32xf32>
    %c0_2 = arith.constant 0 : index
    %c0_3 = arith.constant 0 : index
    %1 = vector.load %arg2[%c0_2, %c0_3] : memref<4x32xf32, #tpu.memory_space<vmem>>, vector<4x32xf32>
    %2 = vector.shape_cast %0 : vector<1x16x32xf32> to vector<1x16x1x32xf32>
    %3 = vector.shape_cast %1 : vector<4x32xf32> to vector<1x1x4x32xf32>
    %4 = vector.broadcast %2 : vector<1x16x1x32xf32> to vector<1x16x4x32xf32>
    %5 = vector.broadcast %3 : vector<1x1x4x32xf32> to vector<1x16x4x32xf32>
    %6 = arith.mulf %4, %5 : vector<1x16x4x32xf32>
    %7 = arith.mulf %6, %6 : vector<1x16x4x32xf32>
    %cst = arith.constant dense<0.000000e+00> : vector<1x16x4xf32>
    %8 = vector.multi_reduction <add>, %7, %cst [3] : vector<1x16x4x32xf32> to vector<1x16x4xf32>
    %9 = vector.shape_cast %8 : vector<1x16x4xf32> to vector<1x16x4x1xf32>
    %cst_4 = arith.constant 1.000000e-24 : f32
    %10 = vector.broadcast %cst_4 : f32 to vector<1x16x4x1xf32>
    %11 = arith.maximumf %9, %10 : vector<1x16x4x1xf32>
    %12 = math.rsqrt %11 : vector<1x16x4x1xf32>
    %cst_5 = arith.constant 5.000000e-01 : f32
    %13 = vector.broadcast %cst_5 : f32 to vector<1x16x4x1xf32>
    %14 = arith.mulf %12, %13 : vector<1x16x4x1xf32>
    %15 = vector.broadcast %14 : vector<1x16x4x1xf32> to vector<1x16x4x32xf32>
    %16 = arith.mulf %6, %15 : vector<1x16x4x32xf32>
    %17 = vector.shape_cast %16 : vector<1x16x4x32xf32> to vector<1x16x128xf32>
    "tpu.trace_start"() <{level = 10 : i32, message = "bnk,bmk->bnm"}> : () -> ()
    %cst_6 = arith.constant dense<0.000000e+00> : vector<1x16x16xf32>
    %18 = tpu.matmul %17, %17, %cst_6 {dimension_numbers = #tpu.dot_dimension_numbers<[2], [2], [1], [1], [0, 0, 0, 1, 1, 1], [0], [0]>} : vector<1x16x128xf32>, vector<1x16x128xf32>, vector<1x16x16xf32> -> vector<1x16x16xf32>
    %cst_7 = arith.constant 3.000000e-01 : f32
    "tpu.trace_stop"() : () -> ()
    %19 = vector.broadcast %cst_7 : f32 to vector<1x16x16xf32>
    %20 = arith.cmpf ogt, %18, %19 : vector<1x16x16xf32>
    %cst_8 = arith.constant 0.000000e+00 : f32
    %21 = vector.broadcast %cst_8 : f32 to vector<1x16x16xf32>
    %22 = arith.select %20, %18, %21 : vector<1x16x16xi1>, vector<1x16x16xf32>
    %23 = vector.shape_cast %22 : vector<1x16x16xf32> to vector<1x1x256xf32>
    %c0_9 = arith.constant 0 : index
    %c0_10 = arith.constant 0 : index
    %c0_11 = arith.constant 0 : index
    %24 = vector.load %arg3[%c0_9, %c0_10, %c0_11] : memref<1x1x256xf32, #tpu.memory_space<vmem>>, vector<1x1x256xf32>
    tpu.vector_store %arg3[%c0_9, %c0_10, %c0_11], %23 {strides = array<i32>} : memref<1x1x256xf32, #tpu.memory_space<vmem>>, vector<1x1x256xf32>,
    return
  }
  func.func @transform_0(%arg0: i32) -> (i32, i32, i32) {
    %c0_i32 = arith.constant 0 : i32
    %c0_i32_0 = arith.constant 0 : i32
    %c0_i32_1 = arith.constant 0 : i32
    return %arg0, %c0_i32, %c0_i32_0 : i32, i32, i32
  }
  func.func @transform_1(%arg0: i32) -> (i32, i32) {
    %c0_i32 = arith.constant 0 : i32
    %c0_i32_0 = arith.constant 0 : i32
    %c0_i32_1 = arith.constant 0 : i32
    return %c0_i32, %c0_i32_0 : i32, i32
  }
  func.func @transform_2(%arg0: i32) -> (i32, i32, i32) {
    %c0_i32 = arith.constant 0 : i32
    %c0_i32_0 = arith.constant 0 : i32
    %c0_i32_1 = arith.constant 0 : i32
    return %arg0, %c0_i32, %c0_i32_0 : i32, i32, i32
  }
}

</mosaic_0001>

<bundles_post_ra>
// kernel: tpu_custom_call.1
= control target key start
LH: loop header
LB: loop body
LE: loop exit
PB: predicated region body
PF: predicated region fallthrough
CT: control target
= control target key end

     0   :  { %7 = vsyncpa [#allocation3], 0  ;;  %s1760_s0 = inlined_call_operand.hbm [shape: f32[2,16,32], index: 0, kind: input, shape index: {}]   ;;  %s1761_s1 = inlined_call_operand.hbm [shape: f32[4,32], index: 1, kind: input, shape index: {}]   ;;  %s1762_s2 = inlined_call_operand.hbm [shape: f32[2,1,256], index: 2, kind: output, shape index: {}]  }
   0x1   :  { %9 = vsyncpa [#allocation3 + $0x1], 0 }
   0x2   :  { %10 = vsyncpa [#allocation6], 0 }
   0x3   :  { %11 = vsyncpa [#allocation4], 0 }
   0x4   :  { %13 = vsyncpa [#allocation4 + $0x1], 0  ;;  %s1354_s9 = smov 0   ;;  %s1356_s10 = smov 0  }
   0x5   :  { %s1358_s11 = smov 0   ;;  %s1360_s12 = smov 0  }
   0x6 LB: > { %s1375_s13 = sadd.s32 4294967295, %s1321_s12   ;;  %s1041_s14 = sadd.s32 4294967294, %s1321_s12   ;;  %s1321_s12 = sphi %s1360_s12, %s1787_s12   ;;  %s1317_s11 = sphi %s1358_s11, %s1786_s11   ;;  %s1313_s10 = sphi %s1356_s10, %s1785_s10   ;;  %s1309_s9 = sphi %s1354_s9, %s1784_s9  }
   0x7   : > { %s1379_s15 = sadd.s32 1, %s1321_s12   ;;  %s26_s16 = sadd.s32 1, %s1317_s11 }
   0x8   : > { %s23_s17 = ssub.s32 %s1321_s12, %s1379_s15  ;;  %p33_p0 = scmp.ne.s32.totalorder %s1317_s11, %s1313_s10 }
   0x9   : > { %p24_p1 = scmp.eq.s32.totalorder %s23_s17, 0  ;;  %p34_p2 = scmp.eq.s32.totalorder %s1321_s12, 0 }
   0xa   : > { %p39_p3 = scmp.ne.s32.totalorder %s1313_s10, %s1309_s9  ;;  %p1763_p4 = scmp.eq.s32.totalorder %s1375_s13, 0 }
   0xb   : > { %s1391_s18 = scalar_select %p24_p1, %s1317_s11, %s26_s16  }
   0xc   : > { %p1393_p5 = por %p34_p2, %p33_p0  ;;  %p1399_p6 = por %p1763_p4, %p39_p3 }
   0xd   : > { %p84_p7 = scmp.eq.s32.totalorder %s1375_s13, 1  ;;  %p90_p8 = scmp.eq.s32.totalorder %s1041_s14, 1 }
   0xe   : > { %s1769_s20 = scalar_select %p1399_p6, 1, 0 }
   0xf   : > { %p1042_p9 = scmp.ge.s32.totalorder %s1321_s12, 1  ;;  %p97_p10 = scmp.lt.s32.totalorder %s1321_s12, 3 }
  0x10   : > { %p1406_p11 = por %p84_p7, %p33_p0  ;;  %p1410_p12 = por %p90_p8, %p39_p3 }
  0x11   : > { %p1414_p13 = pnand %p1042_p9, %p97_p10  ;;  %s1323_s24 = smov [#allocation5]  }
  0x12   : > { %s1770_s21 = scalar_select %p1406_p11, 1, 0 }
  0x13   : > { %s1771_s22 = scalar_select %p1410_p12, 1, 0 }
  0x14   : > { %s1772_s23 = scalar_select %p1414_p13, 1, 0 }
  0x15   : > { %p1082_p2 = pneg %p1414_p13  ;;  %s110_s25 = sshll.u32 %s1323_s24, 4  ;;  %s111_s25 = int_to_ptr.vmem [resolvable:$true] %s110_s25 }
  0x16   : > { %p1095_p4 = scmp.lt.s32.totalorder %s1321_s12, 2  ;;  %p1773_p0 = scmp.eq.s32.totalorder %s1375_s13, 0 }
  0x17   : > { %s121_s27 = sand.u32 1, %s1317_s11   ;;  %s1193_s4 = scalar_lea.hbm %s1761_s1, 64 }
  0x18   : > { %p1424_p7 = pnand %p1082_p2, %p1773_p0  ;;  %p1431_p3 = pnand %p1095_p4, %p1393_p5 }
  0x19   : > { %s1045_s29 = sshll.u32 %s121_s27, 4  ;;  %p1194_p8 = scmp.ne.s32.totalorder %s1761_s1, %s1193_s4 }
  0x1a   : > { %s1775_s28 = scalar_select %p1431_p3, 1, 0 }
  0x1b   : > { %p1195_p9 = pneg %p1424_p7  ;;  %p1200_p4 = scmp.lt.u32.totalorder %s1193_s4, %s1761_s1 }
  0x1d   : > { %p1196_p10 = pnand %p1195_p9, %p1194_p8 }
  0x1f   : > { %p1197_p2 = pneg %p1196_p10 }
  0x21   : > { %p1202_p5 = pnand %p1200_p4, %p1197_p2 }
  0x23   : > { %1205 = shalt.err (!%p1202_p5)
}
  0x24   : > { %s1206_s14 = scalar_lea.vmem %s111_s25, 64  ;;  %p1214_p11 = scmp.lt.s32.totalorder %s111_s25, %s111_s25 }
  0x25   : > { %p1207_p0 = scmp.ne.s32.totalorder %s111_s25, %s1206_s14  ;;  %p1215_p6 = scmp.lt.s32.totalorder %s1206_s14, %s1206_s14 }
  0x27   : > { %p1209_p1 = pnand %p1207_p0, %p1195_p9  ;;  %p1216_p13 = por %p1215_p6, %p1214_p11 }
  0x29   : > { %p1210_p12 = pneg %p1209_p1 }
  0x2b   : > { %p1217_p3 = pnand %p1216_p13, %p1210_p12 }
  0x2d   : > { %1220 = shalt.err (!%p1217_p3)
}
  0x2e   : > { %1085 = dma.hbm_to_vmem [thread:$0]  (!%p1424_p7), %s1761_s1, 64, %s111_s25, [#allocation6]  }
  0x2f   : > { %s1057_s19 = sshll.u32 %s1321_s12, 8  ;;  %s125_s24 = scalar_lea.vmem [#allocation2], %s1045_s29 }
  0x30   : > { %s132_s30 = sshll.u32 %s125_s24, 4  ;;  %s1455_s5 = scalar_lea.hbm %s1760_s0, %s1057_s19  ;;  %s1457_s30 = int_to_ptr.vmem [resolvable:$true] %s132_s30 }
  0x31   : > { %s1459_s26 = scalar_lea.sflag [#allocation3], %s121_s27  ;;  %s1221_s6 = scalar_lea.hbm %s1455_s5, 256 }
  0x32   : > { %p1222_p6 = scmp.ne.s32.totalorder %s1455_s5, %s1221_s6  ;;  %p1776_p11 = scmp.ne.s32.totalorder %s1775_s28, 0 }
  0x33   : > { %s1226_s7 = scalar_lea.hbm %s1760_s0, 512  ;;  %p1227_p7 = scmp.lt.u32.totalorder %s1455_s5, %s1760_s0 }
  0x34   : > { %p1223_p12 = pneg %p1776_p11  ;;  %p1228_p3 = scmp.lt.u32.totalorder %s1226_s7, %s1221_s6 }
  0x35   : > { %p1230_p9 = scmp.lt.u32.totalorder %s1221_s6, %s1455_s5 }
  0x36   : > { %p1224_p13 = pnand %p1223_p12, %p1222_p6  ;;  %p1229_p8 = por %p1228_p3, %p1227_p7 }
  0x38   : > { %p1225_p1 = pneg %p1224_p13  ;;  %p1231_p10 = por %p1230_p9, %p1229_p8 }
  0x3a   : > { %p1232_p2 = pnand %p1231_p10, %p1225_p1 }
  0x3c   : > { %1235 = shalt.err (!%p1232_p2)
}
  0x3d   : > { %s1236_s27 = scalar_lea.vmem %s1457_s30, 256  ;;  %s1324_s16 = smov [#allocation2]  }
  0x3e   : > { %p1237_p4 = scmp.ne.s32.totalorder %s1457_s30, %s1236_s27  ;;  %s1241_s17 = sshll.u32 %s1324_s16, 4  ;;  %s1242_s17 = int_to_ptr.vmem [resolvable:$false] %s1241_s17 }
  0x3f   : > { %s1243_s19 = scalar_lea.vmem %s1242_s17, 512  ;;  %p1244_p6 = scmp.lt.s32.totalorder %s1457_s30, %s1242_s17 }
  0x40   : > { %p1239_p5 = pnand %p1237_p4, %p1223_p12  ;;  %p1245_p13 = scmp.lt.s32.totalorder %s1243_s19, %s1236_s27 }
  0x42   : > { %p1240_p0 = pneg %p1239_p5  ;;  %p1246_p7 = por %p1245_p13, %p1244_p6 }
  0x44   : > { %p1247_p3 = pnand %p1246_p7, %p1240_p0 }
  0x46   : > { %1250 = shalt.err (!%p1247_p3)
}
  0x47   : > { %s1325_s24 = smov 128   ;;  %s1326_s3 = smov 8  }
  0x48   : > { %1089 = dma.hbm_to_vmem [thread:$0]  (!%p1776_p11), %s1455_s5, 256, %s1457_s30, %s1459_s26, %s1325_s24, %s1325_s24, %s1326_s3  }
  0x49   : > { %p1777_p12 = scmp.ne.s32.totalorder %s1772_s23, 0 }
  0x4a   : > { %s1490_s4 = sand.u32 (!%p1777_p12), 1, %s1313_s10   ;;  %p1778_p1 = scmp.ne.s32.totalorder (!%p1777_p12), %s1769_s20, 0 }
  0x4b   : > { %144 = sbr.rel (%p1777_p12) target bundleno = 818 (0x332), region = 28  ;;  %s1049_s6 = sshll.u32 (!%p1777_p12), %s1490_s4, 4 }
  0x4c   : > { %s147_s25 = scalar_lea.sflag (!%p1777_p12), [#allocation3], %s1490_s4  ;;  %s150_s29 = scalar_lea.vmem (!%p1777_p12), [#allocation2], %s1049_s6 }
  0x52   : > { %1296 = dma.done.wait (%p1778_p1), %s147_s25, 256  }
  0x53   : > { %1298 = vsyncadd (%p1778_p1), %s147_s25, 4294967040  ;;  %p1779_p8 = scmp.eq.s32.totalorder %s1375_s13, 0 }
  0x55   : > { %1300 = dma.done.wait (%p1779_p8), [#allocation6], 64   ;;  %p1780_p11 = pmov %p1779_p8 }
  0x56   : > { %v184_v0 = vlaneseq  ;;  %v1327_v1 = vmov 1966171168   ;;  %v175_v6 = vld [vmem:[%s150_s29] sm:$0xff]  ;;  %v176_v7 = vld [vmem:[%s150_s29 + $0x8] sm:$0xff]  ;;  %vm390_vm0 = vcmask 257024   ;;  %s1330_s20 = smov 64  }
  0x57   : > { %1302 = vsyncadd (%p1780_p11), [#allocation6], 4294967232  ;;  %v182_v2 = vunpack.c.l.s4 %v1327_v1  ;;  %v180_v10 = vcombine.high %v175_v6, %v175_v6  ;;  %v1515_v16 = vld [vmem:[#allocation5] sm:$0xf]  ;;  %v229_v17 = vcombine.high %v176_v7, %v176_v7  ;;  %s1331_s23 = smov 32   ;;  %s1332_s28 = smov 96  }
  0x58   : > { %v1503_v3 = vshrl.u32 %v184_v0, 7  ;;  %vm663_vm1 = vcmask 261120   ;;  %vm666_vm2 = vcmask 523264   ;;  %vm669_vm3 = vcmask 785408   ;;  %s1334_s30 = smov 16   ;;  %s1335_s5 = smov 48  }
  0x59   : > { %v183_v4 = vunpack.c.0.s8 %v182_v2  ;;  %s1336_s26 = smov 80   ;;  %s1337_s7 = smov 112   ;;  %vm905_vm6 = vcmask 130048   ;;  %vm908_vm7 = vcmask 392192   ;;  %vm911_vm8 = vcmask 654336  }
  0x5a   : > { %v1510_v9 = vsub.s32 0, %v1503_v3  ;;  %vm914_vm9 = vcmask 916480   ;;  %s1051_s8 = sshll.u32 %s1490_s4, 1  ;;  %s1058_s14 = sshll.u32 %s1375_s13, 5  ;;  %vm943_vm10 = vcmp.lt.s32.totalorder %v184_v0, 256 }
  0x5b   : > { %v1506_v5 = vsub.s32 %v183_v4, %v1503_v3  ;;  %s174_s27 = scalar_lea.vmem [#allocation7], %s1051_s8  ;;  %s1716_s24 = scalar_lea.hbm %s1762_s2, %s1058_s14 }
  0x5c   : > { %s961_s16 = sshll.u32 %s174_s27, 4  ;;  %s947_s13 = scalar_lea.sflag [#allocation4], %s1490_s4  ;;  %s1718_s16 = int_to_ptr.vmem [resolvable:$true] %s961_s16 }
  0x5d   : > { %v187_v8 = vrot.slane %v175_v6, %v1506_v5  ;;  %v236_v11 = vrot.slane %v176_v7, %v1506_v5  ;;  %v194_v18 = vrot.slane %v180_v10, %v1506_v5  ;;  %v243_v45 = vrot.slane %v229_v17, %v1506_v5  ;;  %s1251_s3 = scalar_lea.vmem %s1718_s16, 32  ;;  %p1781_p10 = scmp.ne.s32.totalorder %s1770_s21, 0 }
  0x5e   : > { %p1252_p9 = scmp.ne.s32.totalorder %s1718_s16, %s1251_s3  ;;  %s1338_s6 = smov [#allocation7]  }
  0x5f   : > { %v203_v12 = vrot.slane %v187_v8, %v1506_v5  ;;  %v252_v13 = vrot.slane %v236_v11, %v1506_v5  ;;  %v244_v14 = vcombine.high %v236_v11, %v236_v11  ;;  %v195_v15 = vcombine.high %v187_v8, %v187_v8  ;;  %s1255_s25 = sshll.u32 %s1338_s6, 4  ;;  %s1256_s25 = int_to_ptr.vmem [resolvable:$false] %s1255_s25 }
  0x60   : > { %v210_v24 = vrot.slane %v194_v18, %v1506_v5  ;;  %v196_v25 = vcombine.high %v194_v18, %v194_v18  ;;  %v245_v58 = vcombine.high %v243_v45, %v243_v45  ;;  %v259_v1 = vrot.slane %v243_v45, %v1506_v5  ;;  %p1253_p2 = pnand %p1252_p9, %p1781_p10  ;;  %s1257_s29 = scalar_lea.vmem %s1256_s25, 64 }
  0x61   : > { %v281_v19 = vrot.slane %v203_v12, %v1510_v9  ;;  %v225_v20 = vcombine.high %v203_v12, %v203_v12  ;;  %v313_v21 = vrot.slane %v252_v13, %v1510_v9  ;;  %v266_v22 = vrot.slane %v244_v14, %v1506_v5  ;;  %p1258_p5 = scmp.lt.s32.totalorder %s1718_s16, %s1256_s25  ;;  %p1259_p0 = scmp.lt.s32.totalorder %s1257_s29, %s1251_s3 }
  0x62   : > { %v217_v23 = vrot.slane %v195_v15, %v1506_v5  ;;  %v274_v26 = vcombine.high %v252_v13, %v252_v13  ;;  %v297_v33 = vrot.slane %v210_v24, %v1510_v9  ;;  %v224_v34 = vrot.slane %v196_v25, %v1506_v5  ;;  %p1254_p4 = pneg %p1253_p2 }
  0x63   : > { %v1524_v27 = vmul.f32 %v281_v19, %v1515_v16  ;;  %v289_v28 = vrot.slane %v225_v20, %v1510_v9  ;;  %v1528_v29 = vmul.f32 %v313_v21, %v1515_v16  ;;  %v317_v30 = vrot.slane %v266_v22, %v1510_v9  ;;  %p1260_p6 = por %p1259_p0, %p1258_p5 }
  0x64   : > { %v285_v31 = vrot.slane %v217_v23, %v1510_v9  ;;  %v227_v32 = vcombine.high %v217_v23, %v217_v23  ;;  %v301_v41 = vrot.slane %v224_v34, %v1510_v9  ;;  %v1561_v48 = vmul.f32 %v297_v33, %v1515_v16 }
  0x65   : > { %v374_v35 = vmul.f32 %v1524_v27, %v1524_v27  ;;  %v1537_v36 = vmul.f32 %v289_v28, %v1515_v16  ;;  %v382_v37 = vmul.f32 %v1528_v29, %v1528_v29  ;;  %v1542_v38 = vmul.f32 %v317_v30, %v1515_v16  ;;  %p1261_p13 = pnand %p1260_p6, %p1254_p4 }
  0x66   : > { %v1545_v39 = vmul.f32 %v285_v31, %v1515_v16  ;;  %v293_v40 = vrot.slane %v227_v32, %v1510_v9  ;;  %v321_v51 = vrot.slane %v274_v26, %v1510_v9  ;;  %v276_v52 = vcombine.high %v266_v22, %v266_v22 }
  0x67   : > { %v391_v42 = vsel %vm390_vm0, %v374_v35, 0.0  ;;  %v376_v43 = vmul.f32 %v1537_v36, %v1537_v36  ;;  %v383_v44 = vmul.f32 %v1542_v38, %v1542_v38  ;;  %v415_v50 = vsel %vm390_vm0, %v382_v37, 0.0 }
  0x68   : > { %392 = vadd.xlane.f32.xlu0 %v391_v42  ;;  %v375_v46 = vmul.f32 %v1545_v39, %v1545_v39  ;;  %v1558_v47 = vmul.f32 %v293_v40, %v1515_v16  ;;  %v1568_v54 = vmul.f32 %v301_v41, %v1515_v16  ;;  %v325_v56 = vrot.slane %v276_v52, %v1510_v9 }
  0x69   : > { %v397_v49 = vsel %vm390_vm0, %v376_v43, 0.0  ;;  %v418_v53 = vsel %vm390_vm0, %v383_v44, 0.0  ;;  %v226_v57 = vcombine.high %v210_v24, %v210_v24  ;;  %v378_v60 = vmul.f32 %v1561_v48, %v1561_v48 }
  0x6a   : > { %398 = vadd.xlane.f32.xlu1 %v397_v49  ;;  %v377_v55 = vmul.f32 %v1558_v47, %v1558_v47  ;;  %v394_v59 = vsel %vm390_vm0, %v375_v46, 0.0  ;;  %v1577_v61 = vmul.f32 %v321_v51, %v1515_v16  ;;  %v273_v63 = vrot.slane %v245_v58, %v1506_v5 }
  0x6b   : > { %v305_v62 = vrot.slane %v226_v57, %v1510_v9  ;;  %v379_v2 = vmul.f32 %v1568_v54, %v1568_v54  ;;  %v1586_v6 = vmul.f32 %v325_v56, %v1515_v16  ;;  %v228_v8 = vcombine.high %v224_v34, %v224_v34 }
  0x6c   : > { %416 = vadd.xlane.f32.xlu0 %v415_v50  ;;  %v400_v4 = vsel %vm390_vm0, %v377_v55, 0.0  ;;  %v333_v7 = vrot.slane %v273_v63, %v1510_v9  ;;  %v403_v10 = vsel %vm390_vm0, %v378_v60, 0.0  ;;  %v384_v11 = vmul.f32 %v1577_v61, %v1577_v61 }
  0x6d   : > { %v1593_v12 = vmul.f32 %v305_v62, %v1515_v16  ;;  %v329_v13 = vrot.slane %v259_v1, %v1510_v9  ;;  %v275_v14 = vcombine.high %v259_v1, %v259_v1  ;;  %v406_v15 = vsel %vm390_vm0, %v379_v2, 0.0 }
  0x6e   : > { %419 = vadd.xlane.f32.xlu1 %v418_v53  ;;  %v385_v17 = vmul.f32 %v1586_v6, %v1586_v6  ;;  %v1600_v18 = vmul.f32 %v333_v7, %v1515_v16  ;;  %v309_v19 = vrot.slane %v228_v8, %v1510_v9  ;;  %v277_v20 = vcombine.high %v273_v63, %v273_v63 }
  0x6f   : > { %v421_v21 = vsel %vm390_vm0, %v384_v11, 0.0  ;;  %v380_v22 = vmul.f32 %v1593_v12, %v1593_v12  ;;  %v1607_v23 = vmul.f32 %v329_v13, %v1515_v16  ;;  %v337_v24 = vrot.slane %v275_v14, %v1510_v9 }
  0x70   : > { %395 = vadd.xlane.f32.xlu0 %v394_v59  ;;  %v424_v25 = vsel %vm390_vm0, %v385_v17, 0.0  ;;  %v387_v26 = vmul.f32 %v1600_v18, %v1600_v18  ;;  %v1614_v28 = vmul.f32 %v309_v19, %v1515_v16  ;;  %v341_v30 = vrot.slane %v277_v20, %v1510_v9 }
  0x71   : > { %v409_v31 = vsel %vm390_vm0, %v380_v22, 0.0  ;;  %v386_v32 = vmul.f32 %v1607_v23, %v1607_v23  ;;  %v1621_v33 = vmul.f32 %v337_v24, %v1515_v16 }
  0x72   : > { %401 = vadd.xlane.f32.xlu1 %v400_v4  ;;  %v430_v34 = vsel %vm390_vm0, %v387_v26, 0.0  ;;  %v381_v35 = vmul.f32 %v1614_v28, %v1614_v28  ;;  %v1627_v37 = vmul.f32 %v341_v30, %v1515_v16 }
  0x73   : > { %v427_v9 = vsel %vm390_vm0, %v386_v32, 0.0  ;;  %v388_v40 = vmul.f32 %v1621_v33, %v1621_v33 }
  0x74   : > { %404 = vadd.xlane.f32.xlu0 %v403_v10  ;;  %v412_v41 = vsel %vm390_vm0, %v381_v35, 0.0  ;;  %v389_v42 = vmul.f32 %v1627_v37, %v1627_v37 }
  0x75   : > { %v433_v43 = vsel %vm390_vm0, %v388_v40, 0.0 }
  0x76   : > { %407 = vadd.xlane.f32.xlu1 %v406_v15  ;;  %v436_v44 = vsel %vm390_vm0, %v389_v42, 0.0  ;;  %v1328_v42 = vmov 1983009808  }
  0x78   : > { %422 = vadd.xlane.f32.xlu0 %v421_v21 }
  0x7a   : > { %425 = vadd.xlane.f32.xlu1 %v424_v25 }
  0x7c   : > { %410 = vadd.xlane.f32.xlu0 %v409_v31 }
  0x7e   : > { %431 = vadd.xlane.f32.xlu1 %v430_v34 }
  0x80   : > { %428 = vadd.xlane.f32.xlu0 %v427_v9 }
  0x82   : > { %413 = vadd.xlane.f32.xlu1 %v412_v41 }
  0x84   : > { %434 = vadd.xlane.f32.xlu0 %v433_v43  ;;  %v505_v43 = vunpack.c.l.s4 %v1328_v42 }
  0x86   : > { %437 = vadd.xlane.f32.xlu1 %v436_v44 }
  0xf5   : > { %v393_v16 = vpop.xlane.xlu0 %392 }
  0xf6   : > { %v439_v52 = vmax.f32 %v393_v16, 1e-24 }
  0xf7   : > { %v399_v45 = vpop.xlane.xlu1 %398 }
  0xf8   : > { %v441_v53 = vmax.f32 %v399_v45, 1e-24  ;;  %1161 = vrsqrt.f32 %v439_v52 }
  0xf9   : > { %v417_v46 = vpop.xlane.xlu0 %416 }
  0xfa   : > { %1163 = vrsqrt.f32 %v441_v53  ;;  %v447_v4 = vmax.f32 %v417_v46, 1e-24 }
  0xfb   : > { %v420_v49 = vpop.xlane.xlu1 %419 }
  0xfc   : > { %v448_v59 = vmax.f32 %v420_v49, 1e-24 }
  0xfd   : > { %v396_v50 = vpop.xlane.xlu0 %395 }
  0xfe   : > { %v440_v56 = vmax.f32 %v396_v50, 1e-24 }
  0xff   : > { %v402_v51 = vpop.xlane.xlu1 %401 }
 0x100   : > { %v442_v57 = vmax.f32 %v402_v51, 1e-24  ;;  %1165 = vrsqrt.f32 %v440_v56 }
 0x101   : > { %v405_v55 = vpop.xlane.xlu0 %404 }
 0x102   : > { %v443_v60 = vmax.f32 %v405_v55, 1e-24  ;;  %1167 = vrsqrt.f32 %v442_v57  ;;  %v1162_v15 = vpop.eup %1161  ;;  %v506_v57 = vunpack.c.0.s8 %v505_v43 }
 0x103   : > { %v408_v58 = vpop.xlane.xlu1 %407  ;;  %1169 = vrsqrt.f32 %v448_v59  ;;  %v471_v16 = vmul.f32 0.5, %v1162_v15 }
 0x104   : > { %1171 = vrsqrt.f32 %v443_v60  ;;  %v444_v8 = vmax.f32 %v408_v58, 1e-24  ;;  %v1164_v19 = vpop.eup %1163 }
 0x105   : > { %v423_v62 = vpop.xlane.xlu0 %422  ;;  %v473_v45 = vmul.f32 0.5, %v1164_v19  ;;  %v487_v60 = vmul.f32 %v471_v16, %v1524_v27 }
 0x106   : > { %v449_v63 = vmax.f32 %v423_v62, 1e-24 }
 0x107   : > { %v426_v1 = vpop.xlane.xlu1 %425  ;;  %v489_v62 = vmul.f32 %v473_v45, %v1537_v36 }
 0x108   : > { %v450_v2 = vmax.f32 %v426_v1, 1e-24 }
 0x109   : > { %v411_v7 = vpop.xlane.xlu0 %410 }
 0x10a   : > { %1173 = vrsqrt.f32 %v450_v2  ;;  %v445_v10 = vmax.f32 %v411_v7, 1e-24  ;;  %v1166_v21 = vpop.eup %1165 }
 0x10b   : > { %1175 = vrsqrt.f32 %v449_v63  ;;  %v432_v11 = vpop.xlane.xlu1 %431  ;;  %v472_v35 = vmul.f32 0.5, %v1166_v21 }
 0x10c   : > { %1177 = vrsqrt.f32 %v445_v10  ;;  %v452_v13 = vmax.f32 %v432_v11, 1e-24  ;;  %v1168_v24 = vpop.eup %1167  ;;  %v1329_v10 = vmov 1934713408  }
 0x10d   : > { %1179 = vrsqrt.f32 %v447_v4  ;;  %v429_v14 = vpop.xlane.xlu0 %428  ;;  %v1170_v26 = vpop.eup %1169  ;;  %v474_v9 = vmul.f32 0.5, %v1168_v24  ;;  %v488_v53 = vmul.f32 %v472_v35, %v1545_v39  ;;  %v538_v39 = vunpack.c.l.s4 %v1329_v10 }
 0x10e   : > { %1181 = vrsqrt.f32 %v444_v8  ;;  %v451_v17 = vmax.f32 %v429_v14, 1e-24  ;;  %v1172_v31 = vpop.eup %1171  ;;  %v480_v52 = vmul.f32 0.5, %v1170_v26  ;;  %v1646_v14 = vsub.s32 %v506_v57, %v1503_v3 }
 0x10f   : > { %v414_v20 = vpop.xlane.xlu1 %413  ;;  %v490_v55 = vmul.f32 %v474_v9, %v1558_v47  ;;  %v475_v58 = vmul.f32 0.5, %v1172_v31 }
 0x110   : > { %1183 = vrsqrt.f32 %v451_v17  ;;  %v446_v22 = vmax.f32 %v414_v20, 1e-24  ;;  %v496_v47 = vmul.f32 %v480_v52, %v1542_v38  ;;  %v503_v17 = vcombine.low %v487_v60, %v489_v62 }
 0x111   : > { %1185 = vrsqrt.f32 %v452_v13  ;;  %v435_v25 = vpop.xlane.xlu0 %434  ;;  %v511_v11 = vcombine.low %v488_v53, %v490_v55  ;;  %v491_v27 = vmul.f32 %v475_v58, %v1561_v48 }
 0x112   : > { %1187 = vrsqrt.f32 %v446_v22  ;;  %v453_v30 = vmax.f32 %v435_v25, 1e-24  ;;  %v539_v25 = vunpack.c.0.s8 %v538_v39 }
 0x113   : > { %v438_v32 = vpop.xlane.xlu1 %437  ;;  %v518_v26 = vrot.slane %v511_v11, %v1646_v14 }
 0x114   : > { %v1174_v34 = vpop.eup %1173  ;;  %1189 = vrsqrt.f32 %v453_v30  ;;  %v454_v40 = vmax.f32 %v438_v32, 1e-24  ;;  %v1662_v42 = vsub.s32 %v539_v25, %v1503_v3 }
 0x115   : > { %v1176_v41 = vpop.eup %1175  ;;  %v482_v46 = vmul.f32 0.5, %v1174_v34 }
 0x116   : > { %v1178_v44 = vpop.eup %1177  ;;  %1191 = vrsqrt.f32 %v454_v40  ;;  %v481_v56 = vmul.f32 0.5, %v1176_v41 }
 0x117   : > { %v1180_v49 = vpop.eup %1179  ;;  %v477_v50 = vmul.f32 0.5, %v1178_v44  ;;  %v498_v1 = vmul.f32 %v482_v46, %v1586_v6 }
 0x118   : > { %v1182_v51 = vpop.eup %1181  ;;  %v479_v63 = vmul.f32 0.5, %v1180_v49  ;;  %v497_v13 = vmul.f32 %v481_v56, %v1577_v61 }
 0x119   : > { %v476_v4 = vmul.f32 0.5, %v1182_v51  ;;  %v493_v7 = vmul.f32 %v477_v50, %v1593_v12  ;;  %v579_v12 = vcombine.low %v496_v47, %v498_v1 }
 0x11a   : > { %v1184_v59 = vpop.eup %1183  ;;  %v495_v19 = vmul.f32 %v479_v63, %v1528_v29  ;;  %v510_v29 = vrot.slane %v503_v17, %v1646_v14 }
 0x11b   : > { %v1186_v2 = vpop.eup %1185  ;;  %v483_v36 = vmul.f32 0.5, %v1184_v59  ;;  %v492_v21 = vmul.f32 %v476_v4, %v1568_v54  ;;  %v519_v22 = vcombine.low %v491_v27, %v493_v7  ;;  %v586_v35 = vrot.slane %v579_v12, %v1646_v14 }
 0x11c   : > { %v1188_v8 = vpop.eup %1187  ;;  %v484_v20 = vmul.f32 0.5, %v1186_v2  ;;  %v571_v30 = vcombine.low %v495_v19, %v497_v13  ;;  %v536_v45 = vcombine.high %v510_v29, %v518_v26 }
 0x11d   : > { %v478_v15 = vmul.f32 0.5, %v1188_v8  ;;  %v499_v48 = vmul.f32 %v483_v36, %v1607_v23 }
 0x11e   : > { %v1190_v6 = vpop.eup %1189  ;;  %v500_v54 = vmul.f32 %v484_v20, %v1600_v18  ;;  %v578_v23 = vrot.slane %v571_v30, %v1646_v14  ;;  %v550_v55 = vrot.slane %v536_v45, %v1662_v42 }
 0x11f   : > { %v494_v38 = vmul.f32 %v478_v15, %v1614_v28  ;;  %v485_v24 = vmul.f32 0.5, %v1190_v6  ;;  %v526_v28 = vrot.slane %v519_v22, %v1646_v14 }
 0x120   : > { %v1192_v61 = vpop.eup %1191  ;;  %v604_v46 = vcombine.high %v578_v23, %v586_v35  ;;  %v603_v51 = vcombine.low %v578_v23, %v586_v35 }
 0x121   : > { %v527_v31 = vcombine.low %v492_v21, %v494_v38  ;;  %v501_v32 = vmul.f32 %v485_v24, %v1621_v33  ;;  %v486_v34 = vmul.f32 0.5, %v1192_v61  ;;  %v535_v33 = vcombine.low %v510_v29, %v518_v26 }
 0x122   : > { %v618_v57 = vrot.slane %v604_v46, %v1662_v42  ;;  %v611_v59 = vrot.slane %v603_v51, %v1662_v42 }
 0x123   : > { %v534_v9 = vrot.slane %v527_v31, %v1646_v14  ;;  %v587_v40 = vcombine.low %v499_v48, %v501_v32  ;;  %v502_v41 = vmul.f32 %v486_v34, %v1627_v37  ;;  %v543_v3 = vrot.slane %v535_v33, %v1662_v42 }
 0x125   : > { %v595_v43 = vcombine.low %v500_v54, %v502_v41  ;;  %v552_v44 = vcombine.high %v526_v28, %v534_v9  ;;  %v551_v16 = vcombine.low %v526_v28, %v534_v9  ;;  %v594_v18 = vrot.slane %v587_v40, %v1646_v14 }
 0x126   : > { %v1333_v54 = vmov 0.0  }
 0x127   : > { %v602_v49 = vrot.slane %v595_v43, %v1646_v14  ;;  %v559_v50 = vrot.slane %v551_v16, %v1662_v42  ;;  %v566_v37 = vrot.slane %v552_v44, %v1662_v42 }
 0x129   : > { %v620_v52 = vcombine.high %v594_v18, %v602_v49  ;;  %v619_v53 = vcombine.low %v594_v18, %v602_v49  ;;  %v567_v56 = vcombine.low %v543_v3, %v559_v50  ;;  %v569_v62 = vcombine.low %v550_v55, %v566_v37 }
 0x12a   : > { %v568_v1 = vcombine.high %v543_v3, %v559_v50  ;;  %v570_v39 = vcombine.high %v550_v55, %v566_v37 }
 0x12b   : > { %v634_v58 = vrot.slane %v620_v52, %v1662_v42  ;;  %v627_v60 = vrot.slane %v619_v53, %v1662_v42 }
 0x12d   : > { %v637_v63 = vcombine.low %v618_v57, %v634_v58  ;;  %v636_v2 = vcombine.high %v611_v59, %v627_v60  ;;  %v635_v4 = vcombine.low %v611_v59, %v627_v60  ;;  %v638_v10 = vcombine.high %v618_v57, %v634_v58 }
 0x12f   : > { %v1149_v7 = vpack.i.bf16 %v637_v63, %v569_v62  ;;  %v1144_v8 = vpack.i.bf16 %v636_v2, %v568_v1  ;;  %v1154_v47 = vpack.i.bf16 %v638_v10, %v570_v39 }
 0x131   : > { %1150 = vrot.lane.b32.xlu1 %v1149_v7, %s1330_s20  ;;  %1145 = vrot.lane.b32.xlu0 %v1144_v8, %s1331_s23 }
 0x135   : > { %1155 = vrot.lane.b32.xlu1 %v1154_v47, %s1332_s28 }
 0x1a3   : > { %v1151_v11 = vpop.permute.xlu1 %1150  ;;  %v1146_v13 = vpop.permute.xlu0 %1145 }
 0x1a4   : > { %v1148_v27 = vunpack.i.h.bf16 %v1146_v13  ;;  %v1147_v36 = vunpack.i.l.bf16 %v1146_v13  ;;  %v1153_v15 = vunpack.i.h.bf16 %v1151_v11  ;;  %v1152_v6 = vunpack.i.l.bf16 %v1151_v11 }
 0x1a6   : > { %v665_v17 = vsel %vm663_vm1, %v635_v4, %v1148_v27  ;;  %v664_v19 = vsel %vm663_vm1, %v567_v56, %v1147_v36 }
 0x1a7   : > { %v1156_v12 = vpop.permute.xlu1 %1155  ;;  %v667_v22 = vsel %vm666_vm2, %v664_v19, %v1152_v6  ;;  %v668_v38 = vsel %vm666_vm2, %v665_v17, %v1153_v15 }
 0x1a8   : > { %v1158_v20 = vunpack.i.h.bf16 %v1156_v12  ;;  %v1157_v21 = vunpack.i.l.bf16 %v1156_v12 }
 0x1aa   : > { %v670_v24 = vsel %vm669_vm3, %v667_v22, %v1157_v21  ;;  %v671_v61 = vsel %vm669_vm3, %v668_v38, %v1158_v20 }
 0x1ab   : > { %1067 = vmatprep.mubr.f32.mxu0 %v670_v24  ;;  %v1070_v25 = vpack.c.bf16 %v671_v61, %v670_v24 }
 0x1ad   : > { %1071 = vmatprep.subr.bf16.mxu0 %v1070_v25 }
 0x1ae   : > { %1073 = vmatpush3.bf16.xpose.msra.mxu0 %v1070_v25 }
 0x1b5   : > { %1068 = vmatmul.mubr.f32.vlgmr.msra.gmra.mrb[0].mxu0 %v671_v61 }
 0x288   : > { %v1069_v26 = vpop.f32.mrb[0].mxu0 }
 0x289   : > { %vm748_vm4 = vcmp.gt.f32.partialorder %v1069_v26, 0.3  ;;  %v738_v30 = vpop.f32.mrb[1].mxu0 }
 0x28a   : > { %v750_v48 = vsel %vm748_vm4, %v1069_v26, 0.0  ;;  %vm747_vm5 = vcmp.gt.f32.partialorder %v738_v30, 0.3 }
 0x28b   : > { %v807_v31 = vrot.slane %v750_v48, %v1646_v14  ;;  %v749_v32 = vsel %vm747_vm5, %v738_v30, 0.0  ;;  %v800_v28 = vcombine.high %v750_v48, %v1333_v54 }
 0x28c   : > { %v758_v34 = vrot.slane %v749_v32, %v1646_v14  ;;  %v751_v41 = vcombine.high %v749_v32, %v1333_v54 }
 0x28d   : > { %v822_v29 = vrot.slane %v807_v31, %v1662_v42  ;;  %v815_v9 = vcombine.high %v807_v31, %v1333_v54  ;;  %v814_v43 = vrot.slane %v800_v28, %v1646_v14 }
 0x28e   : > { %v773_v35 = vrot.slane %v758_v34, %v1662_v42  ;;  %v766_v23 = vcombine.high %v758_v34, %v1333_v54  ;;  %v765_v16 = vrot.slane %v751_v41, %v1646_v14 }
 0x28f   : > { %v845_v40 = vcombine.high %v822_v29, %v1333_v54  ;;  %v829_v44 = vrot.slane %v815_v9, %v1662_v42  ;;  %v837_v46 = vrot.slane %v814_v43, %v1662_v42  ;;  %v830_v51 = vcombine.high %v814_v43, %v1333_v54 }
 0x290   : > { %v796_v33 = vcombine.high %v773_v35, %v1333_v54  ;;  %v780_v45 = vrot.slane %v766_v23, %v1662_v42  ;;  %v788_v18 = vrot.slane %v765_v16, %v1662_v42  ;;  %v781_v37 = vcombine.high %v765_v16, %v1333_v54 }
 0x291   : > { %878 = vrot.lane.b32.xlu0 %v845_v40, %s1334_s30  ;;  %v846_v49 = vcombine.high %v829_v44, %v1333_v54  ;;  %v847_v14 = vcombine.high %v837_v46, %v1333_v54  ;;  %v844_v52 = vrot.slane %v830_v51, %v1662_v42 }
 0x292   : > { %850 = vrot.lane.b32.xlu1 %v796_v33, %s1334_s30  ;;  %v797_v50 = vcombine.high %v780_v45, %v1333_v54  ;;  %v798_v3 = vcombine.high %v788_v18, %v1333_v54  ;;  %v795_v53 = vrot.slane %v781_v37, %v1662_v42 }
 0x293   : > { %v848_v55 = vcombine.high %v844_v52, %v1333_v54 }
 0x294   : > { %v799_v56 = vcombine.high %v795_v53, %v1333_v54 }
 0x295   : > { %882 = vrot.lane.b32.xlu0 %v829_v44, %s1331_s23 }
 0x296   : > { %854 = vrot.lane.b32.xlu1 %v780_v45, %s1331_s23 }
 0x299   : > { %890 = vrot.lane.b32.xlu0 %v837_v46, %s1330_s20 }
 0x29a   : > { %862 = vrot.lane.b32.xlu1 %v788_v18, %s1330_s20 }
 0x29d   : > { %886 = vrot.lane.b32.xlu0 %v846_v49, %s1335_s5 }
 0x29e   : > { %858 = vrot.lane.b32.xlu1 %v797_v50, %s1335_s5 }
 0x2a1   : > { %894 = vrot.lane.b32.xlu0 %v847_v14, %s1336_s26 }
 0x2a2   : > { %866 = vrot.lane.b32.xlu1 %v798_v3, %s1336_s26 }
 0x2a5   : > { %898 = vrot.lane.b32.xlu0 %v844_v52, %s1332_s28 }
 0x2a6   : > { %870 = vrot.lane.b32.xlu1 %v795_v53, %s1332_s28 }
 0x2a9   : > { %902 = vrot.lane.b32.xlu0 %v848_v55, %s1337_s7 }
 0x2aa   : > { %874 = vrot.lane.b32.xlu1 %v799_v56, %s1337_s7 }
 0x303   : > { %v879_v57 = vpop.permute.xlu0 %878 }
 0x304   : > { %v851_v58 = vpop.permute.xlu1 %850  ;;  %v916_v4 = vsel %vm905_vm6, %v822_v29, %v879_v57 }
 0x305   : > { %v906_v8 = vsel %vm905_vm6, %v773_v35, %v851_v58 }
 0x307   : > { %v883_v59 = vpop.permute.xlu0 %882 }
 0x308   : > { %v855_v60 = vpop.permute.xlu1 %854  ;;  %v917_v10 = vsel %vm663_vm1, %v916_v4, %v883_v59 }
 0x309   : > { %v907_v39 = vsel %vm663_vm1, %v906_v8, %v855_v60 }
 0x30b   : > { %v891_v62 = vpop.permute.xlu0 %890 }
 0x30c   : > { %v863_v63 = vpop.permute.xlu1 %862 }
 0x30f   : > { %v887_v1 = vpop.permute.xlu0 %886 }
 0x310   : > { %v859_v2 = vpop.permute.xlu1 %858  ;;  %v918_v47 = vsel %vm908_vm7, %v917_v10, %v887_v1 }
 0x311   : > { %v909_v11 = vsel %vm908_vm7, %v907_v39, %v859_v2  ;;  %v919_v36 = vsel %vm666_vm2, %v918_v47, %v891_v62 }
 0x312   : > { %v910_v6 = vsel %vm666_vm2, %v909_v11, %v863_v63 }
 0x313   : > { %v895_v42 = vpop.permute.xlu0 %894 }
 0x314   : > { %v867_v7 = vpop.permute.xlu1 %866  ;;  %v920_v15 = vsel %vm911_vm8, %v919_v36, %v895_v42 }
 0x315   : > { %v912_v17 = vsel %vm911_vm8, %v910_v6, %v867_v7 }
 0x317   : > { %v899_v13 = vpop.permute.xlu0 %898 }
 0x318   : > { %v871_v27 = vpop.permute.xlu1 %870  ;;  %v921_v19 = vsel %vm669_vm3, %v920_v15, %v899_v13 }
 0x319   : > { %v913_v20 = vsel %vm669_vm3, %v912_v17, %v871_v27 }
 0x31b   : > { %v903_v12 = vpop.permute.xlu0 %902 }
 0x31c   : > { %v922_v21 = vsel %vm914_vm9, %v921_v19, %v903_v12  ;;  %v875_v22 = vpop.permute.xlu1 %874 }
 0x31d   : > { %v915_v38 = vsel %vm914_vm9, %v913_v20, %v875_v22 }
 0x31e   : > { %v925_v24 = vcombine.low %v915_v38, %v922_v21 }
 0x320   : > { %v932_v61 = vrot.slane %v925_v24, %v1506_v5 }
 0x322   : > { %v939_v25 = vrot.slane %v932_v61, %v1506_v5 }
 0x324   : > { %945 = vst.msk [vmem:[%s174_s27] sm:$0x3] %vm943_vm10, %v939_v25 }
 0x325   : > { %1264 = shalt.err (!%p1261_p13)
}
 0x326   : > { %s1265_s4 = scalar_lea.hbm %s1716_s24, 32  ;;  %s1269_s28 = scalar_lea.hbm %s1762_s2, 64 }
 0x327   : > { %p1266_p7 = scmp.ne.s32.totalorder %s1716_s24, %s1265_s4  ;;  %p1270_p1 = scmp.lt.u32.totalorder %s1716_s24, %s1762_s2 }
 0x328   : > { %p1271_p8 = scmp.lt.u32.totalorder %s1269_s28, %s1265_s4  ;;  %p1273_p9 = scmp.lt.u32.totalorder %s1265_s4, %s1716_s24 }
 0x329   : > { %p1267_p3 = pnand %p1266_p7, %p1781_p10 }
 0x32a   : > { %p1272_p11 = por %p1271_p8, %p1270_p1 }
 0x32b   : > { %p1268_p12 = pneg %p1267_p3 }
 0x32c   : > { %p1274_p2 = por %p1273_p9, %p1272_p11 }
 0x32e   : > { %p1275_p4 = pnand %p1274_p2, %p1268_p12 }
 0x330   : > { %1278 = shalt.err (!%p1275_p4)
}
 0x331   : > { %1080 = dma.vmem_to_hbm [thread:$0]  (%p1781_p10), %s1718_s16, 32, %s1716_s24, %s947_s13  }
 0x332 PF: > { %s973_s26 = sand.u32 1, %s1309_s9   ;;  %p1782_p5 = scmp.ne.s32.totalorder %s1771_s22, 0 }
 0x333   : > { %p1783_p0 = scmp.ge.s32.totalorder %s1321_s12, 2  ;;  %s974_s7 = scalar_lea.sflag [#allocation4], %s973_s26 }
 0x335   : > { %p1091_p6 = pnand %p1783_p0, %p1782_p5 }
 0x337   : > { %1304 = dma.done.wait (!%p1091_p6), %s974_s7, 32  }
 0x338   : > { %1306 = vsyncadd (!%p1091_p6), %s974_s7, 4294967264  ;;  %p16_p13 = scmp.ge.s32.totalorder %s1379_s15, 4   ;;  %s1784_s9 = smov %s1313_s10 }
 0x339   : > { %s1785_s10 = smov %s1317_s11  ;;  %s1786_s11 = smov %s1391_s18 }
 0x33a   : > { %s1787_s12 = smov %s1379_s15  ;;  %18 = sbr.rel (!%p16_p13) target bundleno = 6 (0x6), region = 77 }
 0x341   :  { %979 = vsyncpa [#allocation3], 1 }
 0x342   :  { %981 = vsyncpa [#allocation3 + $0x1], 1 }
 0x343   :  { %982 = vsyncpa [#allocation6], 1 }
 0x344   :  { %983 = vsyncpa [#allocation4], 1 }
 0x345   :  { %985 = vsyncpa [#allocation4 + $0x1], 1 }

</bundles_post_ra>
